<compile_context>
chip_gen: v5e
topology: v5e:2x2
jax: 0.10.0
libtpu: 0.0.40
codegen_flags: <defaults>
</compile_context>

<pallas_src>
import functools
import math

import jax
import jax.numpy as jnp
from jax.experimental import pallas as pl
from jax.experimental.pallas import tpu as pltpu


# ----------------------------- Pallas kernel ------------------------------- #
def deepset_kernel(
    S,                                            # static: set size (bound via partial)
    x_ref,                                        # (bb*S, Din) bf16, pre-flattened
    ew0, eb0, ew1, eb1, ew2, eb2, ew3, eb3,       # encoder params (W bf16, b f32 (1, out))
    dw0, db0, dw1, db1, dw2, db2, dw3, db3,       # decoder params
    out_ref,                                      # (bb, out_dim) f32
):
    rows, _ = x_ref.shape
    bb = rows // S
    H = ew0.shape[1]

    def lin(h_bf16, w_ref, b_ref):
        # bf16 operands, f32 MXU accumulation, f32 bias add on the VPU.
        return jnp.dot(h_bf16, w_ref[...], preferred_element_type=jnp.float32) + b_ref[...]

    def relu_bf16(h_f32):
        # ReLU in f32 (safe on v5e: no bf16 VPU), cast back to bf16 for the next matmul.
        return jnp.maximum(h_f32, 0.0).astype(jnp.bfloat16)

    # ---- encoder layers 0..2: Linear + ReLU on the flattened (bb*S, .) slab ----
    h = relu_bf16(lin(x_ref[...], ew0, eb0))
    h = relu_bf16(lin(h, ew1, eb1))
    h = relu_bf16(lin(h, ew2, eb2))               # (bb*S, H) bf16

    # ---- sum-pool BEFORE the (ReLU-free) 4th encoder Linear ----
    #   sum_s(h @ W + b) == (sum_s h) @ W + S * b
    p = jnp.sum(h.reshape(bb, S, H), axis=1, dtype=jnp.float32)        # (bb, H) f32
    p = (jnp.dot(p.astype(jnp.bfloat16), ew3[...],
                 preferred_element_type=jnp.float32)
         + float(S) * eb3[...])                   # (bb, H) f32
    p = p.astype(jnp.bfloat16)

    # ---- decoder: Linear/ReLU x3 + Linear + Sigmoid ----
    d = relu_bf16(lin(p, dw0, db0))
    d = relu_bf16(lin(d, dw1, db1))
    d = relu_bf16(lin(d, dw2, db2))
    d = lin(d, dw3, db3)                          # (bb, out_dim) f32
    out_ref[...] = jax.nn.sigmoid(d)


# --------------------------- VMEM / tiling helpers -------------------------- #
def _round_up(x, m):
    return (x + m - 1) // m * m


def _padded_bytes(rows, cols, itemsize, sublane):
    # VMEM tiles are padded to (sublane, 128): sublane = 8 for f32, 16 for bf16.
    return _round_up(max(rows, 1), sublane) * _round_up(max(cols, 1), 128) * itemsize


def _vmem_cap_bytes():
    try:
        return int(pltpu.get_tpu_info().vmem_capacity_bytes)
    except Exception:
        return 64 << 20          # assume the smallest (v7x) part if the query fails


def _param_vmem_bytes(Din, H, out_dim, bufs):
    w = (_padded_bytes(Din, H, 2, 16)
         + 6 * _padded_bytes(H, H, 2, 16)
         + _padded_bytes(H, out_dim, 2, 16))
    b = 7 * _padded_bytes(1, H, 4, 8) + _padded_bytes(1, out_dim, 4, 8)
    return bufs * (w + b)


def _tile_vmem_bytes(bb, S, Din, H, out_dim):
    """Padded-size VMEM estimate for one grid step (worst-case double-buffered params)."""
    x_tile = 2 * _padded_bytes(bb * S, Din, 2, 16)                  # 2-deep input pipeline
    out_tile = 2 * _padded_bytes(bb, out_dim, 4, 8)                 # 2-deep output pipeline
    params = _param_vmem_bytes(Din, H, out_dim, bufs=2)             # conservative (fallback path)
    enc = _padded_bytes(bb * S, H, 4, 8) + _padded_bytes(bb * S, H, 2, 16)  # live encoder acts
    dec = 2 * _padded_bytes(bb, H, 4, 8) + _padded_bytes(bb, out_dim, 4, 8)
    return x_tile + out_tile + params + enc + dec


def _pick_batch_tile(B, S, Din, H, out_dim, max_tile=512):
    cap = int(0.75 * _vmem_cap_bytes())
    # Shrink the tile cap until padded usage (with ~25% headroom) fits per-core VMEM.
    tile_cap = max_tile
    while tile_cap > 8 and int(1.25 * _tile_vmem_bytes(tile_cap, S, Din, H, out_dim)) > cap:
        tile_cap //= 2
    if B <= 8:
        return B                 # tiny batch: one full tile (block == full dims is legal)
    # >= 2 evenly sized grid steps (megacore sharding + DMA/compute overlap);
    # bb is a multiple of 8 so output / intermediate tiles stay sublane-aligned.
    n_tiles = max(2, pl.cdiv(B, tile_cap))
    bb = _round_up(pl.cdiv(B, n_tiles), 8)
    return max(8, min(bb, _round_up(tile_cap, 8), B))


def _vmem_limit_bytes(bb, S, Din, H, out_dim):
    need = 2 * _tile_vmem_bytes(bb, S, Din, H, out_dim)             # generous headroom
    cap = min(int(0.78 * _vmem_cap_bytes()), 100 << 20)             # ~100 MiB on v5e/v6e, ~50 on v7x
    return int(min(max(need, 8 << 20), cap))


# ------------------------------ Python wrapper ------------------------------ #
def deepset_forward(x, params, num_outputs, dim_output, max_batch_tile=512):
    """x: (B, S, dim_input); params: 8 (W, b) tuples, W of shape (in, out)."""
    B, S, Din = x.shape
    H = params[0][0].shape[1]
    out_dim = params[-1][0].shape[1]
    assert out_dim == num_outputs * dim_output

    bb = _pick_batch_tile(B, S, Din, H, out_dim, max_batch_tile)
    grid = (pl.cdiv(B, bb),)

    # Flatten (B, S) in the wrapper: the kernel input tile is one dense 2-D slab.
    x_flat = x.reshape(B * S, Din).astype(jnp.bfloat16)

    flat_params = []
    for (w, b) in params:
        flat_params += [w.astype(jnp.bfloat16),                     # bf16: 2x MXU, half the DMA
                        b.reshape(1, -1).astype(jnp.float32)]       # f32 bias, 2-D for TPU layout

    # Advisory cost estimate so XLA schedules surrounding ops sensibly.
    flops = 2 * (B * S * (Din * H + 2 * H * H) + B * (4 * H * H + H * out_dim))
    bytes_accessed = (x_flat.size * 2 + B * out_dim * 4
                      + sum(int(p.size) * p.dtype.itemsize for p in flat_params))
    cost = pl.CostEstimate(flops=flops, transcendentals=B * out_dim,
                           bytes_accessed=bytes_accessed)

    vmem_limit = _vmem_limit_bytes(bb, S, Din, H, out_dim)

    def build(weight_mode):
        def pspec(shape):
            if weight_mode is None:
                return pl.BlockSpec(shape, lambda i: (0, 0))
            return pl.BlockSpec(shape, lambda i: (0, 0), pipeline_mode=weight_mode)

        in_specs = [pl.BlockSpec((bb * S, Din), lambda i: (i, 0))]
        for p in flat_params:
            in_specs.append(pspec(p.shape))

        grid_spec = pltpu.PrefetchScalarGridSpec(
            num_scalar_prefetch=0,
            grid=grid,
            in_specs=in_specs,
            out_specs=pl.BlockSpec((bb, out_dim), lambda i: (i, 0)),
        )
        return pl.pallas_call(
            functools.partial(deepset_kernel, S),
            out_shape=jax.ShapeDtypeStruct((B, out_dim), jnp.float32),
            grid_spec=grid_spec,
            compiler_params=pltpu.CompilerParams(
                dimension_semantics=("parallel",),   # shard batch tiles on v7x's 2 TCs
                vmem_limit_bytes=vmem_limit,
            ),
            cost_estimate=cost,
        )

    try:
        # Grid-invariant weights/biases -> single-buffered (halves their VMEM footprint).
        out = build(pl.Buffered(1))(x_flat, *flat_params)
    except Exception:
        # Fall back to default (double) buffering if Buffered(1) is not accepted.
        out = build(None)(x_flat, *flat_params)

    return out.reshape(-1, num_outputs, dim_output)


# -------------------------- deterministic param init ------------------------ #
def init_linear(key, fan_in, fan_out):
    # Matches nn.Linear's default U(-1/sqrt(fan_in), 1/sqrt(fan_in)) init scheme.
    kw, kb = jax.random.split(key)
    bound = 1.0 / math.sqrt(fan_in)
    w = jax.random.uniform(kw, (fan_in, fan_out), jnp.float32, -bound, bound)
    b = jax.random.uniform(kb, (fan_out,), jnp.float32, -bound, bound)
    return w, b


def init_deepset_params(key, dim_input, dim_hidden, num_outputs, dim_output):
    sizes = [
        (dim_input, dim_hidden), (dim_hidden, dim_hidden),
        (dim_hidden, dim_hidden), (dim_hidden, dim_hidden),                 # encoder
        (dim_hidden, dim_hidden), (dim_hidden, dim_hidden),
        (dim_hidden, dim_hidden), (dim_hidden, num_outputs * dim_output),   # decoder
    ]
    keys = jax.random.split(key, len(sizes))
    return [init_linear(k, fi, fo) for k, (fi, fo) in zip(keys, sizes)]


# --------------------------- pure-JAX f32 reference -------------------------- #
def deepset_ref(x, params, num_outputs, dim_output):
    h = x
    for i, (w, b) in enumerate(params[:4]):
        h = h @ w + b
        if i < 3:
            h = jnp.maximum(h, 0.0)
    p = jnp.sum(h, axis=-2)
    d = p
    for i, (w, b) in enumerate(params[4:]):
        d = d @ w + b
        if i < 3:
            d = jnp.maximum(d, 0.0)
    d = jax.nn.sigmoid(d)
    return d.reshape(-1, num_outputs, dim_output)


if __name__ == "__main__":
    # Small shapes consistent with the module's forward: X is (batch, set_size, dim_input)
    B, S, dim_input = 2, 8, 4
    dim_hidden, num_outputs, dim_output = 32, 4, 4

    key = jax.random.PRNGKey(0)
    kx, kp = jax.random.split(key)
    x = jax.random.normal(kx, (B, S, dim_input), jnp.float32)
    params = init_deepset_params(kp, dim_input, dim_hidden, num_outputs, dim_output)

    out = deepset_forward(x, params, num_outputs, dim_output)
    out = jax.block_until_ready(out)

    ref = deepset_ref(x, params, num_outputs, dim_output)
    assert out.shape == (B, num_outputs, dim_output), out.shape
    assert bool(jnp.all(jnp.isfinite(out))), "non-finite output"
    # kernel computes matmuls in bf16 (f32 accumulation) -> relaxed tolerance vs f32 ref
    assert jnp.allclose(out, ref, atol=4e-2, rtol=0.0), "mismatch vs reference"

    print("KERNEL_OK")
</pallas_src>

<mosaic_0001>
module attributes {stable_mosaic.version = 11 : i64} {
  func.func @deepset_kernel(%arg0: i32, %arg1: memref<16x4xbf16, #tpu.memory_space<vmem>>, %arg2: memref<4x32xbf16, #tpu.memory_space<vmem>>, %arg3: memref<1x32xf32, #tpu.memory_space<vmem>>, %arg4: memref<32x32xbf16, #tpu.memory_space<vmem>>, %arg5: memref<1x32xf32, #tpu.memory_space<vmem>>, %arg6: memref<32x32xbf16, #tpu.memory_space<vmem>>, %arg7: memref<1x32xf32, #tpu.memory_space<vmem>>, %arg8: memref<32x32xbf16, #tpu.memory_space<vmem>>, %arg9: memref<1x32xf32, #tpu.memory_space<vmem>>, %arg10: memref<32x32xbf16, #tpu.memory_space<vmem>>, %arg11: memref<1x32xf32, #tpu.memory_space<vmem>>, %arg12: memref<32x32xbf16, #tpu.memory_space<vmem>>, %arg13: memref<1x32xf32, #tpu.memory_space<vmem>>, %arg14: memref<32x32xbf16, #tpu.memory_space<vmem>>, %arg15: memref<1x32xf32, #tpu.memory_space<vmem>>, %arg16: memref<32x16xbf16, #tpu.memory_space<vmem>>, %arg17: memref<1x16xf32, #tpu.memory_space<vmem>>, %arg18: memref<2x16xf32, #tpu.memory_space<vmem>>) attributes {dimension_semantics = [#tpu.dimension_semantics<parallel>], iteration_bounds = array<i64: 1>, scalar_prefetch = 0 : i64, scratch_operands = 0 : i64, tpu.core_type = #tpu.core_type<tc>, window_params = [{transform_indices = @transform_0, window_bounds = array<i64: 16, 4>}, {pipeline_mode = #tpu.pipeline_mode<synchronous>, transform_indices = @transform_1, window_bounds = array<i64: 4, 32>}, {pipeline_mode = #tpu.pipeline_mode<synchronous>, transform_indices = @transform_2, window_bounds = array<i64: 1, 32>}, {pipeline_mode = #tpu.pipeline_mode<synchronous>, transform_indices = @transform_3, window_bounds = array<i64: 32, 32>}, {pipeline_mode = #tpu.pipeline_mode<synchronous>, transform_indices = @transform_4, window_bounds = array<i64: 1, 32>}, {pipeline_mode = #tpu.pipeline_mode<synchronous>, transform_indices = @transform_5, window_bounds = array<i64: 32, 32>}, {pipeline_mode = #tpu.pipeline_mode<synchronous>, transform_indices = @transform_6, window_bounds = array<i64: 1, 32>}, {pipeline_mode = #tpu.pipeline_mode<synchronous>, transform_indices = @transform_7, window_bounds = array<i64: 32, 32>}, {pipeline_mode = #tpu.pipeline_mode<synchronous>, transform_indices = @transform_8, window_bounds = array<i64: 1, 32>}, {pipeline_mode = #tpu.pipeline_mode<synchronous>, transform_indices = @transform_9, window_bounds = array<i64: 32, 32>}, {pipeline_mode = #tpu.pipeline_mode<synchronous>, transform_indices = @transform_10, window_bounds = array<i64: 1, 32>}, {pipeline_mode = #tpu.pipeline_mode<synchronous>, transform_indices = @transform_11, window_bounds = array<i64: 32, 32>}, {pipeline_mode = #tpu.pipeline_mode<synchronous>, transform_indices = @transform_12, window_bounds = array<i64: 1, 32>}, {pipeline_mode = #tpu.pipeline_mode<synchronous>, transform_indices = @transform_13, window_bounds = array<i64: 32, 32>}, {pipeline_mode = #tpu.pipeline_mode<synchronous>, transform_indices = @transform_14, window_bounds = array<i64: 1, 32>}, {pipeline_mode = #tpu.pipeline_mode<synchronous>, transform_indices = @transform_15, window_bounds = array<i64: 32, 16>}, {pipeline_mode = #tpu.pipeline_mode<synchronous>, transform_indices = @transform_16, window_bounds = array<i64: 1, 16>}, {transform_indices = @transform_17, window_bounds = array<i64: 2, 16>}]} {
    %c0 = arith.constant 0 : index
    %c0_0 = arith.constant 0 : index
    %0 = vector.load %arg1[%c0, %c0_0] : memref<16x4xbf16, #tpu.memory_space<vmem>>, vector<16x4xbf16>
    %c0_1 = arith.constant 0 : index
    %c0_2 = arith.constant 0 : index
    %1 = vector.load %arg2[%c0_1, %c0_2] : memref<4x32xbf16, #tpu.memory_space<vmem>>, vector<4x32xbf16>
    %cst = arith.constant dense<0.000000e+00> : vector<16x32xf32>
    %2 = tpu.matmul %0, %1, %cst {dimension_numbers = #tpu.dot_dimension_numbers<[1], [0], [0], [1], [0, 0, 1, 1], [], []>} : vector<16x4xbf16>, vector<4x32xbf16>, vector<16x32xf32> -> vector<16x32xf32>
    %c0_3 = arith.constant 0 : index
    %c0_4 = arith.constant 0 : index
    %3 = vector.load %arg3[%c0_3, %c0_4] : memref<1x32xf32, #tpu.memory_space<vmem>>, vector<1x32xf32>
    %4 = vector.broadcast %3 : vector<1x32xf32> to vector<16x32xf32>
    %5 = arith.addf %2, %4 : vector<16x32xf32>
    %cst_5 = arith.constant 0.000000e+00 : f32
    %6 = vector.broadcast %cst_5 : f32 to vector<16x32xf32>
    %7 = arith.maximumf %5, %6 : vector<16x32xf32>
    %8 = arith.truncf %7 : vector<16x32xf32> to vector<16x32xbf16>
    %c0_6 = arith.constant 0 : index
    %c0_7 = arith.constant 0 : index
    %9 = vector.load %arg4[%c0_6, %c0_7] : memref<32x32xbf16, #tpu.memory_space<vmem>>, vector<32x32xbf16>
    %cst_8 = arith.constant dense<0.000000e+00> : vector<16x32xf32>
    %10 = tpu.matmul %8, %9, %cst_8 {dimension_numbers = #tpu.dot_dimension_numbers<[1], [0], [0], [1], [0, 0, 1, 1], [], []>} : vector<16x32xbf16>, vector<32x32xbf16>, vector<16x32xf32> -> vector<16x32xf32>
    %c0_9 = arith.constant 0 : index
    %c0_10 = arith.constant 0 : index
    %11 = vector.load %arg5[%c0_9, %c0_10] : memref<1x32xf32, #tpu.memory_space<vmem>>, vector<1x32xf32>
    %12 = vector.broadcast %11 : vector<1x32xf32> to vector<16x32xf32>
    %13 = arith.addf %10, %12 : vector<16x32xf32>
    %cst_11 = arith.constant 0.000000e+00 : f32
    %14 = vector.broadcast %cst_11 : f32 to vector<16x32xf32>
    %15 = arith.maximumf %13, %14 : vector<16x32xf32>
    %16 = arith.truncf %15 : vector<16x32xf32> to vector<16x32xbf16>
    %c0_12 = arith.constant 0 : index
    %c0_13 = arith.constant 0 : index
    %17 = vector.load %arg6[%c0_12, %c0_13] : memref<32x32xbf16, #tpu.memory_space<vmem>>, vector<32x32xbf16>
    %cst_14 = arith.constant dense<0.000000e+00> : vector<16x32xf32>
    %18 = tpu.matmul %16, %17, %cst_14 {dimension_numbers = #tpu.dot_dimension_numbers<[1], [0], [0], [1], [0, 0, 1, 1], [], []>} : vector<16x32xbf16>, vector<32x32xbf16>, vector<16x32xf32> -> vector<16x32xf32>
    %c0_15 = arith.constant 0 : index
    %c0_16 = arith.constant 0 : index
    %19 = vector.load %arg7[%c0_15, %c0_16] : memref<1x32xf32, #tpu.memory_space<vmem>>, vector<1x32xf32>
    %20 = vector.broadcast %19 : vector<1x32xf32> to vector<16x32xf32>
    %21 = arith.addf %18, %20 : vector<16x32xf32>
    %cst_17 = arith.constant 0.000000e+00 : f32
    %22 = vector.broadcast %cst_17 : f32 to vector<16x32xf32>
    %23 = arith.maximumf %21, %22 : vector<16x32xf32>
    %24 = arith.truncf %23 : vector<16x32xf32> to vector<16x32xbf16>
    %25 = vector.shape_cast %24 : vector<16x32xbf16> to vector<2x8x32xbf16>
    %26 = arith.extf %25 : vector<2x8x32xbf16> to vector<2x8x32xf32>
    %cst_18 = arith.constant dense<0.000000e+00> : vector<2x32xf32>
    %27 = vector.multi_reduction <add>, %26, %cst_18 [1] : vector<2x8x32xf32> to vector<2x32xf32>
    %28 = arith.truncf %27 : vector<2x32xf32> to vector<2x32xbf16>
    %c0_19 = arith.constant 0 : index
    %c0_20 = arith.constant 0 : index
    %29 = vector.load %arg8[%c0_19, %c0_20] : memref<32x32xbf16, #tpu.memory_space<vmem>>, vector<32x32xbf16>
    %cst_21 = arith.constant dense<0.000000e+00> : vector<2x32xf32>
    %30 = tpu.matmul %28, %29, %cst_21 {dimension_numbers = #tpu.dot_dimension_numbers<[1], [0], [0], [1], [0, 0, 1, 1], [], []>} : vector<2x32xbf16>, vector<32x32xbf16>, vector<2x32xf32> -> vector<2x32xf32>
    %c0_22 = arith.constant 0 : index
    %c0_23 = arith.constant 0 : index
    %31 = vector.load %arg9[%c0_22, %c0_23] : memref<1x32xf32, #tpu.memory_space<vmem>>, vector<1x32xf32>
    %cst_24 = arith.constant 8.000000e+00 : f32
    %32 = vector.broadcast %cst_24 : f32 to vector<1x32xf32>
    %33 = arith.mulf %32, %31 : vector<1x32xf32>
    %34 = vector.broadcast %33 : vector<1x32xf32> to vector<2x32xf32>
    %35 = arith.addf %30, %34 : vector<2x32xf32>
    %36 = arith.truncf %35 : vector<2x32xf32> to vector<2x32xbf16>
    %c0_25 = arith.constant 0 : index
    %c0_26 = arith.constant 0 : index
    %37 = vector.load %arg10[%c0_25, %c0_26] : memref<32x32xbf16, #tpu.memory_space<vmem>>, vector<32x32xbf16>
    %cst_27 = arith.constant dense<0.000000e+00> : vector<2x32xf32>
    %38 = tpu.matmul %36, %37, %cst_27 {dimension_numbers = #tpu.dot_dimension_numbers<[1], [0], [0], [1], [0, 0, 1, 1], [], []>} : vector<2x32xbf16>, vector<32x32xbf16>, vector<2x32xf32> -> vector<2x32xf32>
    %c0_28 = arith.constant 0 : index
    %c0_29 = arith.constant 0 : index
    %39 = vector.load %arg11[%c0_28, %c0_29] : memref<1x32xf32, #tpu.memory_space<vmem>>, vector<1x32xf32>
    %40 = vector.broadcast %39 : vector<1x32xf32> to vector<2x32xf32>
    %41 = arith.addf %38, %40 : vector<2x32xf32>
    %cst_30 = arith.constant 0.000000e+00 : f32
    %42 = vector.broadcast %cst_30 : f32 to vector<2x32xf32>
    %43 = arith.maximumf %41, %42 : vector<2x32xf32>
    %44 = arith.truncf %43 : vector<2x32xf32> to vector<2x32xbf16>
    %c0_31 = arith.constant 0 : index
    %c0_32 = arith.constant 0 : index
    %45 = vector.load %arg12[%c0_31, %c0_32] : memref<32x32xbf16, #tpu.memory_space<vmem>>, vector<32x32xbf16>
    %cst_33 = arith.constant dense<0.000000e+00> : vector<2x32xf32>
    %46 = tpu.matmul %44, %45, %cst_33 {dimension_numbers = #tpu.dot_dimension_numbers<[1], [0], [0], [1], [0, 0, 1, 1], [], []>} : vector<2x32xbf16>, vector<32x32xbf16>, vector<2x32xf32> -> vector<2x32xf32>
    %c0_34 = arith.constant 0 : index
    %c0_35 = arith.constant 0 : index
    %47 = vector.load %arg13[%c0_34, %c0_35] : memref<1x32xf32, #tpu.memory_space<vmem>>, vector<1x32xf32>
    %48 = vector.broadcast %47 : vector<1x32xf32> to vector<2x32xf32>
    %49 = arith.addf %46, %48 : vector<2x32xf32>
    %cst_36 = arith.constant 0.000000e+00 : f32
    %50 = vector.broadcast %cst_36 : f32 to vector<2x32xf32>
    %51 = arith.maximumf %49, %50 : vector<2x32xf32>
    %52 = arith.truncf %51 : vector<2x32xf32> to vector<2x32xbf16>
    %c0_37 = arith.constant 0 : index
    %c0_38 = arith.constant 0 : index
    %53 = vector.load %arg14[%c0_37, %c0_38] : memref<32x32xbf16, #tpu.memory_space<vmem>>, vector<32x32xbf16>
    %cst_39 = arith.constant dense<0.000000e+00> : vector<2x32xf32>
    %54 = tpu.matmul %52, %53, %cst_39 {dimension_numbers = #tpu.dot_dimension_numbers<[1], [0], [0], [1], [0, 0, 1, 1], [], []>} : vector<2x32xbf16>, vector<32x32xbf16>, vector<2x32xf32> -> vector<2x32xf32>
    %c0_40 = arith.constant 0 : index
    %c0_41 = arith.constant 0 : index
    %55 = vector.load %arg15[%c0_40, %c0_41] : memref<1x32xf32, #tpu.memory_space<vmem>>, vector<1x32xf32>
    %56 = vector.broadcast %55 : vector<1x32xf32> to vector<2x32xf32>
    %57 = arith.addf %54, %56 : vector<2x32xf32>
    %cst_42 = arith.constant 0.000000e+00 : f32
    %58 = vector.broadcast %cst_42 : f32 to vector<2x32xf32>
    %59 = arith.maximumf %57, %58 : vector<2x32xf32>
    %60 = arith.truncf %59 : vector<2x32xf32> to vector<2x32xbf16>
    %c0_43 = arith.constant 0 : index
    %c0_44 = arith.constant 0 : index
    %61 = vector.load %arg16[%c0_43, %c0_44] : memref<32x16xbf16, #tpu.memory_space<vmem>>, vector<32x16xbf16>
    %cst_45 = arith.constant dense<0.000000e+00> : vector<2x16xf32>
    %62 = tpu.matmul %60, %61, %cst_45 {dimension_numbers = #tpu.dot_dimension_numbers<[1], [0], [0], [1], [0, 0, 1, 1], [], []>} : vector<2x32xbf16>, vector<32x16xbf16>, vector<2x16xf32> -> vector<2x16xf32>
    %c0_46 = arith.constant 0 : index
    %c0_47 = arith.constant 0 : index
    %63 = vector.load %arg17[%c0_46, %c0_47] : memref<1x16xf32, #tpu.memory_space<vmem>>, vector<1x16xf32>
    %64 = vector.broadcast %63 : vector<1x16xf32> to vector<2x16xf32>
    %65 = arith.addf %62, %64 : vector<2x16xf32>
    %66 = arith.negf %65 : vector<2x16xf32>
    %67 = math.exp %66 : vector<2x16xf32>
    %cst_48 = arith.constant 1.000000e+00 : f32
    %68 = vector.broadcast %cst_48 : f32 to vector<2x16xf32>
    %69 = arith.addf %68, %67 : vector<2x16xf32>
    %70 = arith.divf %68, %69 : vector<2x16xf32>
    %c0_49 = arith.constant 0 : index
    %c0_50 = arith.constant 0 : index
    %71 = vector.load %arg18[%c0_49, %c0_50] : memref<2x16xf32, #tpu.memory_space<vmem>>, vector<2x16xf32>
    tpu.vector_store %arg18[%c0_49, %c0_50], %70 {strides = array<i32>} : memref<2x16xf32, #tpu.memory_space<vmem>>, vector<2x16xf32>,
    return
  }
  func.func @transform_0(%arg0: i32) -> (i32, i32) {
    %c0_i32 = arith.constant 0 : i32
    %c0_i32_0 = arith.constant 0 : i32
    return %arg0, %c0_i32 : i32, i32
  }
  func.func @transform_1(%arg0: i32) -> (i32, i32) {
    %c0_i32 = arith.constant 0 : i32
    %c0_i32_0 = arith.constant 0 : i32
    %c0_i32_1 = arith.constant 0 : i32
    return %c0_i32, %c0_i32_0 : i32, i32
  }
  func.func @transform_2(%arg0: i32) -> (i32, i32) {
    %c0_i32 = arith.constant 0 : i32
    %c0_i32_0 = arith.constant 0 : i32
    %c0_i32_1 = arith.constant 0 : i32
    return %c0_i32, %c0_i32_0 : i32, i32
  }
  func.func @transform_3(%arg0: i32) -> (i32, i32) {
    %c0_i32 = arith.constant 0 : i32
    %c0_i32_0 = arith.constant 0 : i32
    %c0_i32_1 = arith.constant 0 : i32
    return %c0_i32, %c0_i32_0 : i32, i32
  }
  func.func @transform_4(%arg0: i32) -> (i32, i32) {
    %c0_i32 = arith.constant 0 : i32
    %c0_i32_0 = arith.constant 0 : i32
    %c0_i32_1 = arith.constant 0 : i32
    return %c0_i32, %c0_i32_0 : i32, i32
  }
  func.func @transform_5(%arg0: i32) -> (i32, i32) {
    %c0_i32 = arith.constant 0 : i32
    %c0_i32_0 = arith.constant 0 : i32
    %c0_i32_1 = arith.constant 0 : i32
    return %c0_i32, %c0_i32_0 : i32, i32
  }
  func.func @transform_6(%arg0: i32) -> (i32, i32) {
    %c0_i32 = arith.constant 0 : i32
    %c0_i32_0 = arith.constant 0 : i32
    %c0_i32_1 = arith.constant 0 : i32
    return %c0_i32, %c0_i32_0 : i32, i32
  }
  func.func @transform_7(%arg0: i32) -> (i32, i32) {
    %c0_i32 = arith.constant 0 : i32
    %c0_i32_0 = arith.constant 0 : i32
    %c0_i32_1 = arith.constant 0 : i32
    return %c0_i32, %c0_i32_0 : i32, i32
  }
  func.func @transform_8(%arg0: i32) -> (i32, i32) {
    %c0_i32 = arith.constant 0 : i32
    %c0_i32_0 = arith.constant 0 : i32
    %c0_i32_1 = arith.constant 0 : i32
    return %c0_i32, %c0_i32_0 : i32, i32
  }
  func.func @transform_9(%arg0: i32) -> (i32, i32) {
    %c0_i32 = arith.constant 0 : i32
    %c0_i32_0 = arith.constant 0 : i32
    %c0_i32_1 = arith.constant 0 : i32
    return %c0_i32, %c0_i32_0 : i32, i32
  }
  func.func @transform_10(%arg0: i32) -> (i32, i32) {
    %c0_i32 = arith.constant 0 : i32
    %c0_i32_0 = arith.constant 0 : i32
    %c0_i32_1 = arith.constant 0 : i32
    return %c0_i32, %c0_i32_0 : i32, i32
  }
  func.func @transform_11(%arg0: i32) -> (i32, i32) {
    %c0_i32 = arith.constant 0 : i32
    %c0_i32_0 = arith.constant 0 : i32
    %c0_i32_1 = arith.constant 0 : i32
    return %c0_i32, %c0_i32_0 : i32, i32
  }
  func.func @transform_12(%arg0: i32) -> (i32, i32) {
    %c0_i32 = arith.constant 0 : i32
    %c0_i32_0 = arith.constant 0 : i32
    %c0_i32_1 = arith.constant 0 : i32
    return %c0_i32, %c0_i32_0 : i32, i32
  }
  func.func @transform_13(%arg0: i32) -> (i32, i32) {
    %c0_i32 = arith.constant 0 : i32
    %c0_i32_0 = arith.constant 0 : i32
    %c0_i32_1 = arith.constant 0 : i32
    return %c0_i32, %c0_i32_0 : i32, i32
  }
  func.func @transform_14(%arg0: i32) -> (i32, i32) {
    %c0_i32 = arith.constant 0 : i32
    %c0_i32_0 = arith.constant 0 : i32
    %c0_i32_1 = arith.constant 0 : i32
    return %c0_i32, %c0_i32_0 : i32, i32
  }
  func.func @transform_15(%arg0: i32) -> (i32, i32) {
    %c0_i32 = arith.constant 0 : i32
    %c0_i32_0 = arith.constant 0 : i32
    %c0_i32_1 = arith.constant 0 : i32
    return %c0_i32, %c0_i32_0 : i32, i32
  }
  func.func @transform_16(%arg0: i32) -> (i32, i32) {
    %c0_i32 = arith.constant 0 : i32
    %c0_i32_0 = arith.constant 0 : i32
    %c0_i32_1 = arith.constant 0 : i32
    return %c0_i32, %c0_i32_0 : i32, i32
  }
  func.func @transform_17(%arg0: i32) -> (i32, i32) {
    %c0_i32 = arith.constant 0 : i32
    %c0_i32_0 = arith.constant 0 : i32
    return %arg0, %c0_i32 : i32, i32
  }
}

module attributes {stable_mosaic.version = 11 : i64} {
  func.func @deepset_kernel(%arg0: i32, %arg1: memref<16x4xbf16, #tpu.memory_space<vmem>>, %arg2: memref<4x32xbf16, #tpu.memory_space<vmem>>, %arg3: memref<1x32xf32, #tpu.memory_space<vmem>>, %arg4: memref<32x32xbf16, #tpu.memory_space<vmem>>, %arg5: memref<1x32xf32, #tpu.memory_space<vmem>>, %arg6: memref<32x32xbf16, #tpu.memory_space<vmem>>, %arg7: memref<1x32xf32, #tpu.memory_space<vmem>>, %arg8: memref<32x32xbf16, #tpu.memory_space<vmem>>, %arg9: memref<1x32xf32, #tpu.memory_space<vmem>>, %arg10: memref<32x32xbf16, #tpu.memory_space<vmem>>, %arg11: memref<1x32xf32, #tpu.memory_space<vmem>>, %arg12: memref<32x32xbf16, #tpu.memory_space<vmem>>, %arg13: memref<1x32xf32, #tpu.memory_space<vmem>>, %arg14: memref<32x32xbf16, #tpu.memory_space<vmem>>, %arg15: memref<1x32xf32, #tpu.memory_space<vmem>>, %arg16: memref<32x16xbf16, #tpu.memory_space<vmem>>, %arg17: memref<1x16xf32, #tpu.memory_space<vmem>>, %arg18: memref<2x16xf32, #tpu.memory_space<vmem>>) attributes {dimension_semantics = [#tpu.dimension_semantics<parallel>], iteration_bounds = array<i64: 1>, scalar_prefetch = 0 : i64, scratch_operands = 0 : i64, tpu.core_type = #tpu.core_type<tc>, window_params = [{transform_indices = @transform_0, window_bounds = array<i64: 16, 4>}, {pipeline_mode = #tpu.pipeline_mode<synchronous>, transform_indices = @transform_1, window_bounds = array<i64: 4, 32>}, {pipeline_mode = #tpu.pipeline_mode<synchronous>, transform_indices = @transform_2, window_bounds = array<i64: 1, 32>}, {pipeline_mode = #tpu.pipeline_mode<synchronous>, transform_indices = @transform_3, window_bounds = array<i64: 32, 32>}, {pipeline_mode = #tpu.pipeline_mode<synchronous>, transform_indices = @transform_4, window_bounds = array<i64: 1, 32>}, {pipeline_mode = #tpu.pipeline_mode<synchronous>, transform_indices = @transform_5, window_bounds = array<i64: 32, 32>}, {pipeline_mode = #tpu.pipeline_mode<synchronous>, transform_indices = @transform_6, window_bounds = array<i64: 1, 32>}, {pipeline_mode = #tpu.pipeline_mode<synchronous>, transform_indices = @transform_7, window_bounds = array<i64: 32, 32>}, {pipeline_mode = #tpu.pipeline_mode<synchronous>, transform_indices = @transform_8, window_bounds = array<i64: 1, 32>}, {pipeline_mode = #tpu.pipeline_mode<synchronous>, transform_indices = @transform_9, window_bounds = array<i64: 32, 32>}, {pipeline_mode = #tpu.pipeline_mode<synchronous>, transform_indices = @transform_10, window_bounds = array<i64: 1, 32>}, {pipeline_mode = #tpu.pipeline_mode<synchronous>, transform_indices = @transform_11, window_bounds = array<i64: 32, 32>}, {pipeline_mode = #tpu.pipeline_mode<synchronous>, transform_indices = @transform_12, window_bounds = array<i64: 1, 32>}, {pipeline_mode = #tpu.pipeline_mode<synchronous>, transform_indices = @transform_13, window_bounds = array<i64: 32, 32>}, {pipeline_mode = #tpu.pipeline_mode<synchronous>, transform_indices = @transform_14, window_bounds = array<i64: 1, 32>}, {pipeline_mode = #tpu.pipeline_mode<synchronous>, transform_indices = @transform_15, window_bounds = array<i64: 32, 16>}, {pipeline_mode = #tpu.pipeline_mode<synchronous>, transform_indices = @transform_16, window_bounds = array<i64: 1, 16>}, {transform_indices = @transform_17, window_bounds = array<i64: 2, 16>}]} {
    %c0 = arith.constant 0 : index
    %c0_0 = arith.constant 0 : index
    %0 = vector.load %arg1[%c0, %c0_0] : memref<16x4xbf16, #tpu.memory_space<vmem>>, vector<16x4xbf16>
    %c0_1 = arith.constant 0 : index
    %c0_2 = arith.constant 0 : index
    %1 = vector.load %arg2[%c0_1, %c0_2] : memref<4x32xbf16, #tpu.memory_space<vmem>>, vector<4x32xbf16>
    %cst = arith.constant dense<0.000000e+00> : vector<16x32xf32>
    %2 = tpu.matmul %0, %1, %cst {dimension_numbers = #tpu.dot_dimension_numbers<[1], [0], [0], [1], [0, 0, 1, 1], [], []>} : vector<16x4xbf16>, vector<4x32xbf16>, vector<16x32xf32> -> vector<16x32xf32>
    %c0_3 = arith.constant 0 : index
    %c0_4 = arith.constant 0 : index
    %3 = vector.load %arg3[%c0_3, %c0_4] : memref<1x32xf32, #tpu.memory_space<vmem>>, vector<1x32xf32>
    %4 = vector.broadcast %3 : vector<1x32xf32> to vector<16x32xf32>
    %5 = arith.addf %2, %4 : vector<16x32xf32>
    %cst_5 = arith.constant 0.000000e+00 : f32
    %6 = vector.broadcast %cst_5 : f32 to vector<16x32xf32>
    %7 = arith.maximumf %5, %6 : vector<16x32xf32>
    %8 = arith.truncf %7 : vector<16x32xf32> to vector<16x32xbf16>
    %c0_6 = arith.constant 0 : index
    %c0_7 = arith.constant 0 : index
    %9 = vector.load %arg4[%c0_6, %c0_7] : memref<32x32xbf16, #tpu.memory_space<vmem>>, vector<32x32xbf16>
    %cst_8 = arith.constant dense<0.000000e+00> : vector<16x32xf32>
    %10 = tpu.matmul %8, %9, %cst_8 {dimension_numbers = #tpu.dot_dimension_numbers<[1], [0], [0], [1], [0, 0, 1, 1], [], []>} : vector<16x32xbf16>, vector<32x32xbf16>, vector<16x32xf32> -> vector<16x32xf32>
    %c0_9 = arith.constant 0 : index
    %c0_10 = arith.constant 0 : index
    %11 = vector.load %arg5[%c0_9, %c0_10] : memref<1x32xf32, #tpu.memory_space<vmem>>, vector<1x32xf32>
    %12 = vector.broadcast %11 : vector<1x32xf32> to vector<16x32xf32>
    %13 = arith.addf %10, %12 : vector<16x32xf32>
    %cst_11 = arith.constant 0.000000e+00 : f32
    %14 = vector.broadcast %cst_11 : f32 to vector<16x32xf32>
    %15 = arith.maximumf %13, %14 : vector<16x32xf32>
    %16 = arith.truncf %15 : vector<16x32xf32> to vector<16x32xbf16>
    %c0_12 = arith.constant 0 : index
    %c0_13 = arith.constant 0 : index
    %17 = vector.load %arg6[%c0_12, %c0_13] : memref<32x32xbf16, #tpu.memory_space<vmem>>, vector<32x32xbf16>
    %cst_14 = arith.constant dense<0.000000e+00> : vector<16x32xf32>
    %18 = tpu.matmul %16, %17, %cst_14 {dimension_numbers = #tpu.dot_dimension_numbers<[1], [0], [0], [1], [0, 0, 1, 1], [], []>} : vector<16x32xbf16>, vector<32x32xbf16>, vector<16x32xf32> -> vector<16x32xf32>
    %c0_15 = arith.constant 0 : index
    %c0_16 = arith.constant 0 : index
    %19 = vector.load %arg7[%c0_15, %c0_16] : memref<1x32xf32, #tpu.memory_space<vmem>>, vector<1x32xf32>
    %20 = vector.broadcast %19 : vector<1x32xf32> to vector<16x32xf32>
    %21 = arith.addf %18, %20 : vector<16x32xf32>
    %cst_17 = arith.constant 0.000000e+00 : f32
    %22 = vector.broadcast %cst_17 : f32 to vector<16x32xf32>
    %23 = arith.maximumf %21, %22 : vector<16x32xf32>
    %24 = arith.truncf %23 : vector<16x32xf32> to vector<16x32xbf16>
    %25 = vector.shape_cast %24 : vector<16x32xbf16> to vector<2x8x32xbf16>
    %26 = arith.extf %25 : vector<2x8x32xbf16> to vector<2x8x32xf32>
    %cst_18 = arith.constant dense<0.000000e+00> : vector<2x32xf32>
    %27 = vector.multi_reduction <add>, %26, %cst_18 [1] : vector<2x8x32xf32> to vector<2x32xf32>
    %28 = arith.truncf %27 : vector<2x32xf32> to vector<2x32xbf16>
    %c0_19 = arith.constant 0 : index
    %c0_20 = arith.constant 0 : index
    %29 = vector.load %arg8[%c0_19, %c0_20] : memref<32x32xbf16, #tpu.memory_space<vmem>>, vector<32x32xbf16>
    %cst_21 = arith.constant dense<0.000000e+00> : vector<2x32xf32>
    %30 = tpu.matmul %28, %29, %cst_21 {dimension_numbers = #tpu.dot_dimension_numbers<[1], [0], [0], [1], [0, 0, 1, 1], [], []>} : vector<2x32xbf16>, vector<32x32xbf16>, vector<2x32xf32> -> vector<2x32xf32>
    %c0_22 = arith.constant 0 : index
    %c0_23 = arith.constant 0 : index
    %31 = vector.load %arg9[%c0_22, %c0_23] : memref<1x32xf32, #tpu.memory_space<vmem>>, vector<1x32xf32>
    %cst_24 = arith.constant 8.000000e+00 : f32
    %32 = vector.broadcast %cst_24 : f32 to vector<1x32xf32>
    %33 = arith.mulf %32, %31 : vector<1x32xf32>
    %34 = vector.broadcast %33 : vector<1x32xf32> to vector<2x32xf32>
    %35 = arith.addf %30, %34 : vector<2x32xf32>
    %36 = arith.truncf %35 : vector<2x32xf32> to vector<2x32xbf16>
    %c0_25 = arith.constant 0 : index
    %c0_26 = arith.constant 0 : index
    %37 = vector.load %arg10[%c0_25, %c0_26] : memref<32x32xbf16, #tpu.memory_space<vmem>>, vector<32x32xbf16>
    %cst_27 = arith.constant dense<0.000000e+00> : vector<2x32xf32>
    %38 = tpu.matmul %36, %37, %cst_27 {dimension_numbers = #tpu.dot_dimension_numbers<[1], [0], [0], [1], [0, 0, 1, 1], [], []>} : vector<2x32xbf16>, vector<32x32xbf16>, vector<2x32xf32> -> vector<2x32xf32>
    %c0_28 = arith.constant 0 : index
    %c0_29 = arith.constant 0 : index
    %39 = vector.load %arg11[%c0_28, %c0_29] : memref<1x32xf32, #tpu.memory_space<vmem>>, vector<1x32xf32>
    %40 = vector.broadcast %39 : vector<1x32xf32> to vector<2x32xf32>
    %41 = arith.addf %38, %40 : vector<2x32xf32>
    %cst_30 = arith.constant 0.000000e+00 : f32
    %42 = vector.broadcast %cst_30 : f32 to vector<2x32xf32>
    %43 = arith.maximumf %41, %42 : vector<2x32xf32>
    %44 = arith.truncf %43 : vector<2x32xf32> to vector<2x32xbf16>
    %c0_31 = arith.constant 0 : index
    %c0_32 = arith.constant 0 : index
    %45 = vector.load %arg12[%c0_31, %c0_32] : memref<32x32xbf16, #tpu.memory_space<vmem>>, vector<32x32xbf16>
    %cst_33 = arith.constant dense<0.000000e+00> : vector<2x32xf32>
    %46 = tpu.matmul %44, %45, %cst_33 {dimension_numbers = #tpu.dot_dimension_numbers<[1], [0], [0], [1], [0, 0, 1, 1], [], []>} : vector<2x32xbf16>, vector<32x32xbf16>, vector<2x32xf32> -> vector<2x32xf32>
    %c0_34 = arith.constant 0 : index
    %c0_35 = arith.constant 0 : index
    %47 = vector.load %arg13[%c0_34, %c0_35] : memref<1x32xf32, #tpu.memory_space<vmem>>, vector<1x32xf32>
    %48 = vector.broadcast %47 : vector<1x32xf32> to vector<2x32xf32>
    %49 = arith.addf %46, %48 : vector<2x32xf32>
    %cst_36 = arith.constant 0.000000e+00 : f32
    %50 = vector.broadcast %cst_36 : f32 to vector<2x32xf32>
    %51 = arith.maximumf %49, %50 : vector<2x32xf32>
    %52 = arith.truncf %51 : vector<2x32xf32> to vector<2x32xbf16>
    %c0_37 = arith.constant 0 : index
    %c0_38 = arith.constant 0 : index
    %53 = vector.load %arg14[%c0_37, %c0_38] : memref<32x32xbf16, #tpu.memory_space<vmem>>, vector<32x32xbf16>
    %cst_39 = arith.constant dense<0.000000e+00> : vector<2x32xf32>
    %54 = tpu.matmul %52, %53, %cst_39 {dimension_numbers = #tpu.dot_dimension_numbers<[1], [0], [0], [1], [0, 0, 1, 1], [], []>} : vector<2x32xbf16>, vector<32x32xbf16>, vector<2x32xf32> -> vector<2x32xf32>
    %c0_40 = arith.constant 0 : index
    %c0_41 = arith.constant 0 : index
    %55 = vector.load %arg15[%c0_40, %c0_41] : memref<1x32xf32, #tpu.memory_space<vmem>>, vector<1x32xf32>
    %56 = vector.broadcast %55 : vector<1x32xf32> to vector<2x32xf32>
    %57 = arith.addf %54, %56 : vector<2x32xf32>
    %cst_42 = arith.constant 0.000000e+00 : f32
    %58 = vector.broadcast %cst_42 : f32 to vector<2x32xf32>
    %59 = arith.maximumf %57, %58 : vector<2x32xf32>
    %60 = arith.truncf %59 : vector<2x32xf32> to vector<2x32xbf16>
    %c0_43 = arith.constant 0 : index
    %c0_44 = arith.constant 0 : index
    %61 = vector.load %arg16[%c0_43, %c0_44] : memref<32x16xbf16, #tpu.memory_space<vmem>>, vector<32x16xbf16>
    %cst_45 = arith.constant dense<0.000000e+00> : vector<2x16xf32>
    %62 = tpu.matmul %60, %61, %cst_45 {dimension_numbers = #tpu.dot_dimension_numbers<[1], [0], [0], [1], [0, 0, 1, 1], [], []>} : vector<2x32xbf16>, vector<32x16xbf16>, vector<2x16xf32> -> vector<2x16xf32>
    %c0_46 = arith.constant 0 : index
    %c0_47 = arith.constant 0 : index
    %63 = vector.load %arg17[%c0_46, %c0_47] : memref<1x16xf32, #tpu.memory_space<vmem>>, vector<1x16xf32>
    %64 = vector.broadcast %63 : vector<1x16xf32> to vector<2x16xf32>
    %65 = arith.addf %62, %64 : vector<2x16xf32>
    %66 = arith.negf %65 : vector<2x16xf32>
    %67 = math.exp %66 : vector<2x16xf32>
    %cst_48 = arith.constant 1.000000e+00 : f32
    %68 = vector.broadcast %cst_48 : f32 to vector<2x16xf32>
    %69 = arith.addf %68, %67 : vector<2x16xf32>
    %70 = arith.divf %68, %69 : vector<2x16xf32>
    %c0_49 = arith.constant 0 : index
    %c0_50 = arith.constant 0 : index
    %71 = vector.load %arg18[%c0_49, %c0_50] : memref<2x16xf32, #tpu.memory_space<vmem>>, vector<2x16xf32>
    tpu.vector_store %arg18[%c0_49, %c0_50], %70 {strides = array<i32>} : memref<2x16xf32, #tpu.memory_space<vmem>>, vector<2x16xf32>,
    return
  }
  func.func @transform_0(%arg0: i32) -> (i32, i32) {
    %c0_i32 = arith.constant 0 : i32
    %c0_i32_0 = arith.constant 0 : i32
    return %arg0, %c0_i32 : i32, i32
  }
  func.func @transform_1(%arg0: i32) -> (i32, i32) {
    %c0_i32 = arith.constant 0 : i32
    %c0_i32_0 = arith.constant 0 : i32
    %c0_i32_1 = arith.constant 0 : i32
    return %c0_i32, %c0_i32_0 : i32, i32
  }
  func.func @transform_2(%arg0: i32) -> (i32, i32) {
    %c0_i32 = arith.constant 0 : i32
    %c0_i32_0 = arith.constant 0 : i32
    %c0_i32_1 = arith.constant 0 : i32
    return %c0_i32, %c0_i32_0 : i32, i32
  }
  func.func @transform_3(%arg0: i32) -> (i32, i32) {
    %c0_i32 = arith.constant 0 : i32
    %c0_i32_0 = arith.constant 0 : i32
    %c0_i32_1 = arith.constant 0 : i32
    return %c0_i32, %c0_i32_0 : i32, i32
  }
  func.func @transform_4(%arg0: i32) -> (i32, i32) {
    %c0_i32 = arith.constant 0 : i32
    %c0_i32_0 = arith.constant 0 : i32
    %c0_i32_1 = arith.constant 0 : i32
    return %c0_i32, %c0_i32_0 : i32, i32
  }
  func.func @transform_5(%arg0: i32) -> (i32, i32) {
    %c0_i32 = arith.constant 0 : i32
    %c0_i32_0 = arith.constant 0 : i32
    %c0_i32_1 = arith.constant 0 : i32
    return %c0_i32, %c0_i32_0 : i32, i32
  }
  func.func @transform_6(%arg0: i32) -> (i32, i32) {
    %c0_i32 = arith.constant 0 : i32
    %c0_i32_0 = arith.constant 0 : i32
    %c0_i32_1 = arith.constant 0 : i32
    return %c0_i32, %c0_i32_0 : i32, i32
  }
  func.func @transform_7(%arg0: i32) -> (i32, i32) {
    %c0_i32 = arith.constant 0 : i32
    %c0_i32_0 = arith.constant 0 : i32
    %c0_i32_1 = arith.constant 0 : i32
    return %c0_i32, %c0_i32_0 : i32, i32
  }
  func.func @transform_8(%arg0: i32) -> (i32, i32) {
    %c0_i32 = arith.constant 0 : i32
    %c0_i32_0 = arith.constant 0 : i32
    %c0_i32_1 = arith.constant 0 : i32
    return %c0_i32, %c0_i32_0 : i32, i32
  }
  func.func @transform_9(%arg0: i32) -> (i32, i32) {
    %c0_i32 = arith.constant 0 : i32
    %c0_i32_0 = arith.constant 0 : i32
    %c0_i32_1 = arith.constant 0 : i32
    return %c0_i32, %c0_i32_0 : i32, i32
  }
  func.func @transform_10(%arg0: i32) -> (i32, i32) {
    %c0_i32 = arith.constant 0 : i32
    %c0_i32_0 = arith.constant 0 : i32
    %c0_i32_1 = arith.constant 0 : i32
    return %c0_i32, %c0_i32_0 : i32, i32
  }
  func.func @transform_11(%arg0: i32) -> (i32, i32) {
    %c0_i32 = arith.constant 0 : i32
    %c0_i32_0 = arith.constant 0 : i32
    %c0_i32_1 = arith.constant 0 : i32
    return %c0_i32, %c0_i32_0 : i32, i32
  }
  func.func @transform_12(%arg0: i32) -> (i32, i32) {
    %c0_i32 = arith.constant 0 : i32
    %c0_i32_0 = arith.constant 0 : i32
    %c0_i32_1 = arith.constant 0 : i32
    return %c0_i32, %c0_i32_0 : i32, i32
  }
  func.func @transform_13(%arg0: i32) -> (i32, i32) {
    %c0_i32 = arith.constant 0 : i32
    %c0_i32_0 = arith.constant 0 : i32
    %c0_i32_1 = arith.constant 0 : i32
    return %c0_i32, %c0_i32_0 : i32, i32
  }
  func.func @transform_14(%arg0: i32) -> (i32, i32) {
    %c0_i32 = arith.constant 0 : i32
    %c0_i32_0 = arith.constant 0 : i32
    %c0_i32_1 = arith.constant 0 : i32
    return %c0_i32, %c0_i32_0 : i32, i32
  }
  func.func @transform_15(%arg0: i32) -> (i32, i32) {
    %c0_i32 = arith.constant 0 : i32
    %c0_i32_0 = arith.constant 0 : i32
    %c0_i32_1 = arith.constant 0 : i32
    return %c0_i32, %c0_i32_0 : i32, i32
  }
  func.func @transform_16(%arg0: i32) -> (i32, i32) {
    %c0_i32 = arith.constant 0 : i32
    %c0_i32_0 = arith.constant 0 : i32
    %c0_i32_1 = arith.constant 0 : i32
    return %c0_i32, %c0_i32_0 : i32, i32
  }
  func.func @transform_17(%arg0: i32) -> (i32, i32) {
    %c0_i32 = arith.constant 0 : i32
    %c0_i32_0 = arith.constant 0 : i32
    return %arg0, %c0_i32 : i32, i32
  }
}

</mosaic_0001>

<bundles_post_ra>
// kernel: tpu_custom_call.1
= control target key start
LH: loop header
LB: loop body
LE: loop exit
PB: predicated region body
PF: predicated region fallthrough
CT: control target
= control target key end

     0   :  { %s1068_s0 = inlined_call_operand.vmem [shape: bf16[16,4], index: 0, kind: input, shape index: {}]   ;;  %s1069_s1 = inlined_call_operand.hbm [shape: bf16[4,32], index: 1, kind: input, shape index: {}]   ;;  %s1070_s2 = inlined_call_operand.hbm [shape: f32[1,32], index: 2, kind: input, shape index: {}]   ;;  %s1071_s3 = inlined_call_operand.vmem [shape: bf16[32,32], index: 3, kind: input, shape index: {}]   ;;  %s1072_s4 = inlined_call_operand.hbm [shape: f32[1,32], index: 4, kind: input, shape index: {}]   ;;  %s1073_s5 = inlined_call_operand.vmem [shape: bf16[32,32], index: 5, kind: input, shape index: {}]   ;;  %s1074_s6 = inlined_call_operand.hbm [shape: f32[1,32], index: 6, kind: input, shape index: {}]   ;;  %s1075_s7 = inlined_call_operand.hbm [shape: bf16[32,32], index: 7, kind: input, shape index: {}]   ;;  %s1076_s8 = inlined_call_operand.vmem [shape: f32[1,32], index: 8, kind: input, shape index: {}]   ;;  %s1077_s9 = inlined_call_operand.hbm [shape: bf16[32,32], index: 9, kind: input, shape index: {}]   ;;  %s1078_s10 = inlined_call_operand.vmem [shape: f32[1,32], index: 10, kind: input, shape index: {}]   ;;  %s1079_s11 = inlined_call_operand.hbm [shape: bf16[32,32], index: 11, kind: input, shape index: {}]   ;;  %s1080_s12 = inlined_call_operand.vmem [shape: f32[1,32], index: 12, kind: input, shape index: {}]   ;;  %s1081_s13 = inlined_call_operand.hbm [shape: bf16[32,32], index: 13, kind: input, shape index: {}]   ;;  %s1082_s14 = inlined_call_operand.vmem [shape: f32[1,32], index: 14, kind: input, shape index: {}]   ;;  %s1083_s15 = inlined_call_operand.vmem [shape: bf16[32,16], index: 15, kind: input, shape index: {}]   ;;  %s1084_s16 = inlined_call_operand.vmem [shape: f32[1,16], index: 16, kind: input, shape index: {}]   ;;  %s1085_s17 = inlined_call_operand.hbm [shape: f32[2,16], index: 17, kind: output, shape index: {}]  }
   0x1   :  { %1086 = sst [smem:[#allocation23_spill]] %s1068_s0 }
   0x2   :  { %1087 = sst [smem:[#allocation24_spill]] %s1069_s1 }
   0x3   :  { %22 = vsyncpa [#allocation3], 0 }
   0x4   :  { %23 = vsyncpa [#allocation6], 0 }
   0x5   :  { %24 = vsyncpa [#allocation9], 0 }
   0x6   :  { %25 = vsyncpa [#allocation12], 0 }
   0x7   :  { %26 = vsyncpa [#allocation15], 0  ;;  %s46_s26 = sshll.u32 %s1070_s2, 4  ;;  %s47_s26 = int_to_ptr.hbm [resolvable:$true] %s46_s26 }
   0x8   :  { %27 = vsyncpa [#allocation4], 0  ;;  %s883_s27 = smov [#allocation5]   ;;  %s72_s30 = sshll.u32 %s1074_s6, 4  ;;  %s73_s30 = int_to_ptr.hbm [resolvable:$true] %s72_s30 }
   0x9   :  { %s48_s28 = sshll.u32 %s883_s27, 4  ;;  %s884_s18 = smov [#allocation8]   ;;  %s49_s28 = int_to_ptr.vmem [resolvable:$true] %s48_s28 }
   0xa   :  { %51 = dma.hbm_to_vmem [thread:$0]  %s47_s26, 16, %s49_s28, [#allocation6]  }
   0xb   :  { %s74_s19 = sshll.u32 %s884_s18, 4  ;;  %s97_s21 = sshll.u32 %s1077_s9, 4  ;;  %s75_s19 = int_to_ptr.vmem [resolvable:$true] %s74_s19  ;;  %s98_s21 = int_to_ptr.hbm [resolvable:$true] %s97_s21 }
   0xc   :  { %77 = dma.hbm_to_vmem [thread:$0]  %s73_s30, 16, %s75_s19, [#allocation9]  }
   0xd   :  { %s885_s2 = smov [#allocation11]   ;;  %s1088_s25 = sld [smem:[#allocation24_spill]] }
   0xe   :  { %s99_s22 = sshll.u32 %s885_s2, 4  ;;  %s886_s29 = smov 64   ;;  %s100_s22 = int_to_ptr.vmem [resolvable:$true] %s99_s22 }
   0xf   :  { %s887_s6 = smov 4   ;;  %s888_s26 = smov [#allocation2]  }
  0x10   :  { %105 = dma.hbm_to_vmem [thread:$0]  %s98_s21, 256, %s100_s22, [#allocation12], %s886_s29, %s886_s29, %s887_s6  }
  0x11   :  { %s37_s28 = sshll.u32 %s888_s26, 4  ;;  %s59_s9 = sshll.u32 %s1072_s4, 4  ;;  %s38_s28 = int_to_ptr.vmem [resolvable:$true] %s37_s28  ;;  %s60_s9 = int_to_ptr.hbm [resolvable:$true] %s59_s9 }
  0x12   :  { %s82_s1 = sshll.u32 %s1075_s7, 4  ;;  %s889_s20 = smov [#allocation7]   ;;  %s83_s1 = int_to_ptr.hbm [resolvable:$true] %s82_s1 }
  0x13   :  { %s35_s27 = sshll.u32 %s1088_s25, 4  ;;  %s61_s2 = sshll.u32 %s889_s20, 4  ;;  %s36_s27 = int_to_ptr.hbm [resolvable:$true] %s35_s27  ;;  %s62_s2 = int_to_ptr.vmem [resolvable:$true] %s61_s2 }
  0x14   :  { %40 = dma.hbm_to_vmem [thread:$0]  %s36_s27, 32, %s38_s28, [#allocation3]  }
  0x15   :  { %64 = dma.hbm_to_vmem [thread:$0]  %s60_s9, 16, %s62_s2, [#allocation6]  }
  0x16   :  { %s890_s21 = smov [#allocation10]   ;;  %s112_s25 = sshll.u32 %s1079_s11, 4  ;;  %s113_s25 = int_to_ptr.hbm [resolvable:$true] %s112_s25 }
  0x17   :  { %s84_s22 = sshll.u32 %s890_s21, 4  ;;  %s127_s7 = sshll.u32 %s1081_s13, 4  ;;  %s85_s22 = int_to_ptr.vmem [resolvable:$true] %s84_s22  ;;  %s128_s7 = int_to_ptr.hbm [resolvable:$true] %s127_s7 }
  0x18   :  { %90 = dma.hbm_to_vmem [thread:$0]  %s83_s1, 256, %s85_s22, [#allocation9], %s886_s29, %s886_s29, %s887_s6  }
  0x19   :  { %s891_s26 = smov [#allocation13]   ;;  %s892_s0 = smov [#allocation14]  }
  0x1a   :  { %s114_s28 = sshll.u32 %s891_s26, 4  ;;  %s129_s11 = sshll.u32 %s892_s0, 4  ;;  %s115_s28 = int_to_ptr.vmem [resolvable:$true] %s114_s28  ;;  %s130_s11 = int_to_ptr.vmem [resolvable:$true] %s129_s11 }
  0x1b   :  { %120 = dma.hbm_to_vmem [thread:$0]  %s113_s25, 256, %s115_s28, [#allocation12], %s886_s29, %s886_s29, %s887_s6  }
  0x1c   :  { %135 = dma.hbm_to_vmem [thread:$0]  %s128_s7, 256, %s130_s11, [#allocation15], %s886_s29, %s886_s29, %s887_s6  }
  0x1d   :  { %871 = dma.done.wait [#allocation3], 32  }
  0x1e   :  { %872 = vsyncadd [#allocation3], 4294967264 }
  0x1f   :  { %873 = dma.done.wait [#allocation6], 32  }
  0x20   :  { %874 = vsyncadd [#allocation6], 4294967264 }
  0x21   :  { %875 = dma.done.wait [#allocation9], 272  }
  0x22   :  { %876 = vsyncadd [#allocation9], 4294967024 }
  0x23   :  { %877 = dma.done.wait [#allocation12], 512  }
  0x24   :  { %878 = vsyncadd [#allocation12], 4294966784 }
  0x25   :  { %879 = dma.done.wait [#allocation15], 256  }
  0x26   :  { %880 = vsyncadd [#allocation15], 4294967040  ;;  %vm191_vm0 = vcmask 1041408   ;;  %v177_v0 = vld [vmem:[#allocation2] sm:$0x3]  ;;  %s1089_s9 = sld [smem:[#allocation23_spill]] }
  0x27   :  { %v193_v1 = vsel %vm191_vm0, %v177_v0, 0  ;;  %vm187_vm1 = vcmask 31744   ;;  %v620_v3 = vld [vmem:[%s1071_s3 + $0x8] sm:$0xff]  ;;  %v619_v4 = vld [vmem:[%s1071_s3] sm:$0xff]  ;;  %vm232_vm2 = vcmask 261120   ;;  %v624_v23 = vld [vmem:[#allocation10 + $0x8] sm:$0xff] }
  0x28   :  { %202 = vmatpush.bf16.msra.mxu0 %v193_v1  ;;  %242 = vmatpush.bf16.msra.mxu1 %v620_v3  ;;  %v644_v6 = vld [vmem:[#allocation5] ss:$0 sm:$0xff]  ;;  %v622_v13 = vld [vmem:[%s1073_s5 + $0x8] sm:$0xff]  ;;  %v645_v16 = vld [vmem:[#allocation7] ss:$0 sm:$0xff]  ;;  %vm325_vm3 = vcmask 1041409  }
  0x29   :  { %282 = vmatpush.bf16.msra.mxu2 %v622_v13  ;;  %v621_v14 = vld [vmem:[%s1073_s5] sm:$0xff]  ;;  %349 = vmatpush.bf16.msra.mxu3 %v624_v23  ;;  %v623_v25 = vld [vmem:[#allocation10] sm:$0xff]  ;;  %v625_v32 = vld [vmem:[#allocation11] sm:$0xff]  ;;  %vm526_vm7 = vcmask 123904  }
  0x2a   :  { %v646_v24 = vld [vmem:[#allocation8] ss:$0 sm:$0xff]  ;;  %v628_v58 = vld [vmem:[#allocation13 + $0x8] sm:$0xff]  ;;  %v627_v59 = vld [vmem:[#allocation13] sm:$0xff] }
  0x2b   :  { %v626_v30 = vld [vmem:[#allocation11 + $0x8] sm:$0xff] }
  0x2c   :  { %v618_v2 = vld [vmem:[%s1089_s9] sm:$0xff]  ;;  %243 = vmatpush.bf16.msra.mxu1 %v619_v4  ;;  %386 = vmatpush.bf16.msrb.mxu0 %v626_v30  ;;  %v629_v4 = vld [vmem:[#allocation14] sm:$0xff] }
  0x2d   :  { %553 = vmatmul.msk.bf16.vlgmr.msra.gmra.mxu0 %vm187_vm1, %v618_v2  ;;  %283 = vmatpush.bf16.msra.mxu2 %v621_v14  ;;  %v316_v60 = vld [vmem:[%s1076_s8] sm:$0x1] }
  0x2e   :  { %350 = vmatpush.bf16.msra.mxu3 %v623_v25  ;;  %v317_v61 = vmul.f32 8.0, %v316_v60  ;;  %v630_v3 = vld [vmem:[#allocation14 + $0x8] sm:$0xff] }
  0x2f   :  { %v648_v13 = vld [vmem:[%s1080_s12] ss:$0 sm:$0xff] }
  0x30   :  { %387 = vmatpush.bf16.msrb.mxu0 %v625_v32  ;;  %424 = vmatpush.bf16.msrb.mxu1 %v628_v58  ;;  %v319_v62 = vperm.slane %v317_v61, 0  ;;  %v650_v25 = vld [vmem:[%s1084_s16] ss:$0 sm:$0xff]  ;;  %s535_s16 = sshll.u32 %s1085_s17, 4  ;;  %s536_s16 = int_to_ptr.hbm [resolvable:$true] %s535_s16 }
  0x31   :  { %462 = vmatpush.bf16.msrb.mxu2 %v630_v3 }
  0x34   :  { %425 = vmatpush.bf16.msrb.mxu1 %v627_v59 }
  0x35   :  { %463 = vmatpush.bf16.msrb.mxu2 %v629_v4 }
  0xaa   :  { %v204_v5 = vpop.f32.mrf.mxu0 }
  0xab   :  { %v205_v7 = vadd.f32 %v644_v6, %v204_v5  ;;  %v647_v5 = vld [vmem:[%s1078_s10] ss:$0 sm:$0xff] }
  0xad   :  { %v209_v10 = vmax.f32 %v205_v7, 0.0 }
  0xb2   :  { %v206_v8 = vpop.f32.mrf.mxu0 }
  0xb3   :  { %v207_v9 = vadd.f32 %v644_v6, %v206_v8 }
  0xb5   :  { %v210_v11 = vmax.f32 %v207_v9, 0.0 }
  0xb7   :  { %v211_v12 = vpack.c.bf16 %v210_v11, %v209_v10  ;;  %v632_v11 = vld [vmem:[%s1083_s15 + $0x8] sm:$0xff] }
  0xb8   :  { %500 = vmatpush.bf16.msrb.mxu3 %v632_v11 }
  0xb9   :  { %562 = vmatmul.msk.bf16.vlgmr.msra.gmra.mxu1 %vm232_vm2, %v211_v12  ;;  %v631_v12 = vld [vmem:[%s1083_s15] sm:$0xff] }
  0xbc   :  { %501 = vmatpush.bf16.msrb.mxu3 %v631_v12 }
 0x136   :  { %v245_v15 = vpop.f32.mrf.mxu1 }
 0x137   :  { %v246_v17 = vadd.f32 %v645_v16, %v245_v15 }
 0x139   :  { %v250_v20 = vmax.f32 %v246_v17, 0.0 }
 0x13e   :  { %v247_v18 = vpop.f32.mrf.mxu1 }
 0x13f   :  { %v248_v19 = vadd.f32 %v645_v16, %v247_v18 }
 0x141   :  { %v251_v21 = vmax.f32 %v248_v19, 0.0  ;;  %v649_v19 = vld [vmem:[%s1082_s14] ss:$0 sm:$0xff]  ;;  %s893_s14 = smov [#allocation16]  }
 0x142   :  { %s533_s28 = sshll.u32 %s893_s14, 4  ;;  %s534_s28 = int_to_ptr.vmem [resolvable:$true] %s533_s28 }
 0x143   :  { %v252_v22 = vpack.c.bf16 %v251_v21, %v250_v20 }
 0x145   :  { %571 = vmatmul.msk.bf16.vlgmr.msra.gmra.mxu2 %vm232_vm2, %v252_v22 }
 0x1c8   :  { %v285_v26 = vpop.f32.mrf.mxu2 }
 0x1c9   :  { %v286_v27 = vadd.f32 %v646_v24, %v285_v26 }
 0x1cb   :  { %v290_v28 = vmax.f32 %v286_v27, 0.0 }
 0x1cd   :  { %v292_v29 = vpack.c.bf16 %v290_v28, %v290_v28 }
 0x1cf   :  { %v294_v31 = vunpack.c.l.bf16 %v292_v29 }
 0x1d0   :  { %v287_v33 = vpop.f32.mrf.mxu2 }
 0x1d1   :  { %v296_v34 = vsel %vm232_vm2, %v294_v31, 0.0  ;;  %v288_v35 = vadd.f32 %v646_v24, %v287_v33 }
 0x1d2   :  { %v297_v36 = vrot.slane %v296_v34, 4 }
 0x1d3   :  { %v291_v37 = vmax.f32 %v288_v35, 0.0 }
 0x1d4   :  { %v298_v38 = vadd.f32 %v297_v36, %v296_v34 }
 0x1d5   :  { %v293_v39 = vpack.c.bf16 %v291_v37, %v291_v37 }
 0x1d6   :  { %v299_v40 = vrot.slane %v298_v38, 2 }
 0x1d7   :  { %v295_v41 = vunpack.c.l.bf16 %v293_v39 }
 0x1d8   :  { %v300_v42 = vadd.f32 %v299_v40, %v298_v38 }
 0x1d9   :  { %v303_v43 = vsel %vm232_vm2, %v295_v41, 0.0 }
 0x1da   :  { %v304_v44 = vrot.slane %v303_v43, 4  ;;  %v301_v45 = vrot.slane %v300_v42, 1 }
 0x1dc   :  { %v305_v46 = vadd.f32 %v304_v44, %v303_v43  ;;  %v302_v48 = vadd.f32 %v301_v45, %v300_v42 }
 0x1de   :  { %v306_v47 = vrot.slane %v305_v46, 2  ;;  %v310_v52 = vpack.c.bf16 %v302_v48, %v302_v48 }
 0x1e0   :  { %v307_v49 = vadd.f32 %v306_v47, %v305_v46  ;;  %v323_v54 = vunpack.c.l.b16 %v310_v52 }
 0x1e2   :  { %v308_v50 = vrot.slane %v307_v49, 1 }
 0x1e4   :  { %v309_v51 = vadd.f32 %v308_v50, %v307_v49 }
 0x1e6   :  { %v311_v53 = vpack.c.bf16 %v309_v51, %v309_v51 }
 0x1e8   :  { %v324_v55 = vunpack.c.l.b16 %v311_v53 }
 0x1ea   :  { %v326_v56 = vsel %vm325_vm3, %v324_v55, %v323_v54 }
 0x1eb   :  { %v327_v57 = vpack.c.b16 %v326_v56, %v326_v56 }
 0x1ed   :  { %580 = vmatmul.msk.bf16.vlgmr.msra.gmra.mxu3 %vm232_vm2, %v327_v57 }
 0x270   :  { %v352_v63 = vpop.f32.mrf.mxu3 }
 0x271   :  { %v353_v0 = vadd.f32 %v352_v63, %v319_v62 }
 0x273   :  { %v356_v1 = vpack.c.bf16 %v353_v0, %v353_v0 }
 0x275   :  { %589 = vmatmul.msk.bf16.vlgmr.msrb.gmra.mxu0 %vm232_vm2, %v356_v1 }
 0x278   :  { %v354_v2 = vpop.f32.mrf.mxu3 }
 0x2f2   :  { %v389_v6 = vpop.f32.mrf.mxu0 }
 0x2f3   :  { %v390_v7 = vadd.f32 %v647_v5, %v389_v6 }
 0x2f5   :  { %v393_v8 = vmax.f32 %v390_v7, 0.0 }
 0x2f7   :  { %v394_v9 = vpack.c.bf16 %v393_v8, %v393_v8 }
 0x2f9   :  { %598 = vmatmul.msk.bf16.vlgmr.msrb.gmra.mxu1 %vm232_vm2, %v394_v9 }
 0x2fa   :  { %v391_v10 = vpop.f32.mrf.mxu0 }
 0x376   :  { %v427_v14 = vpop.f32.mrf.mxu1 }
 0x377   :  { %v428_v15 = vadd.f32 %v648_v13, %v427_v14 }
 0x379   :  { %v431_v16 = vmax.f32 %v428_v15, 0.0 }
 0x37b   :  { %v432_v17 = vpack.c.bf16 %v431_v16, %v431_v16 }
 0x37d   :  { %607 = vmatmul.msk.bf16.vlgmr.msrb.gmra.mxu2 %vm232_vm2, %v432_v17 }
 0x37e   :  { %v429_v18 = vpop.f32.mrf.mxu1 }
 0x400   :  { %v465_v20 = vpop.f32.mrf.mxu2 }
 0x401   :  { %v466_v21 = vadd.f32 %v649_v19, %v465_v20 }
 0x403   :  { %v469_v22 = vmax.f32 %v466_v21, 0.0 }
 0x405   :  { %v470_v23 = vpack.c.bf16 %v469_v22, %v469_v22 }
 0x407   :  { %616 = vmatmul.msk.bf16.vlgmr.msrb.gmra.mxu3 %vm232_vm2, %v470_v23 }
 0x408   :  { %v467_v24 = vpop.f32.mrf.mxu2 }
 0x48a   :  { %v503_v26 = vpop.f32.mrf.mxu3 }
 0x48b   :  { %v504_v27 = vadd.f32 %v650_v25, %v503_v26 }
 0x48d   :  { %v617_v28 = vmul.f32 -1.442695, %v504_v27 }
 0x48f   :  { %651 = vpow2.f32 %v617_v28 }
 0x492   :  { %v505_v29 = vpop.f32.mrf.mxu3 }
 0x495   :  { %v652_v30 = vpop.eup %651 }
 0x496   :  { %v510_v31 = vadd.f32 1.0, %v652_v30 }
 0x498   :  { %653 = vrcp.f32 %v510_v31  ;;  %v522_v35 = vand.u32 2147483648, %v510_v31  ;;  %v520_v37 = vand.u32 2147483647, %v510_v31  ;;  %vm516_vm5 = vweird.f32 %v510_v31 }
 0x49a   :  { %v523_v39 = vor.u32 1.1754944e-38, %v522_v35  ;;  %vm521_vm8 = vcmp.eq.f32.partialorder %v520_v37, 8.507059e+37 }
 0x49e   :  { %v654_v32 = vpop.eup %653 }
 0x49f   :  { %v512_v33 = vmul.f32 %v654_v32, %v510_v31  ;;  %vm517_vm4 = vweird.f32 %v654_v32 }
 0x4a0   :  { %vm518_vm6 = vmor %vm516_vm5, %vm517_vm4 }
 0x4a1   :  { %v513_v34 = vsub.f32 1.0, %v512_v33 }
 0x4a3   :  { %v514_v36 = vmul.f32 %v654_v32, %v513_v34 }
 0x4a5   :  { %v515_v38 = vadd.f32 %v654_v32, %v514_v36 }
 0x4a7   :  { %v519_v40 = vsel %vm518_vm6, %v654_v32, %v515_v38 }
 0x4a8   :  { %v524_v41 = vsel %vm521_vm8, %v523_v39, %v519_v40 }
 0x4a9   :  { %527 = vst.msk [vmem:[#allocation16] sm:$0x3] %vm526_vm7, %v524_v41 }
 0x4aa   :  { %538 = dma.vmem_to_hbm [thread:$0]  %s534_s28, 32, %s536_s16, [#allocation4]  }
 0x4ab   :  { %881 = dma.done.wait [#allocation4], 32  }
 0x4ac   :  { %882 = vsyncadd [#allocation4], 4294967264 }
 0x4ad   :  { %543 = vsyncpa [#allocation3], 1 }
 0x4ae   :  { %544 = vsyncpa [#allocation6], 1 }
 0x4af   :  { %545 = vsyncpa [#allocation9], 1 }
 0x4b0   :  { %546 = vsyncpa [#allocation12], 1 }
 0x4b1   :  { %547 = vsyncpa [#allocation15], 1 }
 0x4b2   :  { %548 = vsyncpa [#allocation4], 1 }

// kernel: tpu_custom_call.1
= control target key start
LH: loop header
LB: loop body
LE: loop exit
PB: predicated region body
PF: predicated region fallthrough
CT: control target
= control target key end

     0   :  { %s1068_s0 = inlined_call_operand.vmem [shape: bf16[16,4], index: 0, kind: input, shape index: {}]   ;;  %s1069_s1 = inlined_call_operand.hbm [shape: bf16[4,32], index: 1, kind: input, shape index: {}]   ;;  %s1070_s2 = inlined_call_operand.hbm [shape: f32[1,32], index: 2, kind: input, shape index: {}]   ;;  %s1071_s3 = inlined_call_operand.vmem [shape: bf16[32,32], index: 3, kind: input, shape index: {}]   ;;  %s1072_s4 = inlined_call_operand.hbm [shape: f32[1,32], index: 4, kind: input, shape index: {}]   ;;  %s1073_s5 = inlined_call_operand.vmem [shape: bf16[32,32], index: 5, kind: input, shape index: {}]   ;;  %s1074_s6 = inlined_call_operand.hbm [shape: f32[1,32], index: 6, kind: input, shape index: {}]   ;;  %s1075_s7 = inlined_call_operand.hbm [shape: bf16[32,32], index: 7, kind: input, shape index: {}]   ;;  %s1076_s8 = inlined_call_operand.vmem [shape: f32[1,32], index: 8, kind: input, shape index: {}]   ;;  %s1077_s9 = inlined_call_operand.hbm [shape: bf16[32,32], index: 9, kind: input, shape index: {}]   ;;  %s1078_s10 = inlined_call_operand.vmem [shape: f32[1,32], index: 10, kind: input, shape index: {}]   ;;  %s1079_s11 = inlined_call_operand.hbm [shape: bf16[32,32], index: 11, kind: input, shape index: {}]   ;;  %s1080_s12 = inlined_call_operand.vmem [shape: f32[1,32], index: 12, kind: input, shape index: {}]   ;;  %s1081_s13 = inlined_call_operand.hbm [shape: bf16[32,32], index: 13, kind: input, shape index: {}]   ;;  %s1082_s14 = inlined_call_operand.vmem [shape: f32[1,32], index: 14, kind: input, shape index: {}]   ;;  %s1083_s15 = inlined_call_operand.vmem [shape: bf16[32,16], index: 15, kind: input, shape index: {}]   ;;  %s1084_s16 = inlined_call_operand.vmem [shape: f32[1,16], index: 16, kind: input, shape index: {}]   ;;  %s1085_s17 = inlined_call_operand.hbm [shape: f32[2,16], index: 17, kind: output, shape index: {}]  }
   0x1   :  { %1086 = sst [smem:[#allocation23_spill]] %s1068_s0 }
   0x2   :  { %1087 = sst [smem:[#allocation24_spill]] %s1069_s1 }
   0x3   :  { %22 = vsyncpa [#allocation3], 0 }
   0x4   :  { %23 = vsyncpa [#allocation6], 0 }
   0x5   :  { %24 = vsyncpa [#allocation9], 0 }
   0x6   :  { %25 = vsyncpa [#allocation12], 0 }
   0x7   :  { %26 = vsyncpa [#allocation15], 0  ;;  %s46_s26 = sshll.u32 %s1070_s2, 4  ;;  %s47_s26 = int_to_ptr.hbm [resolvable:$true] %s46_s26 }
   0x8   :  { %27 = vsyncpa [#allocation4], 0  ;;  %s883_s27 = smov [#allocation5]   ;;  %s72_s30 = sshll.u32 %s1074_s6, 4  ;;  %s73_s30 = int_to_ptr.hbm [resolvable:$true] %s72_s30 }
   0x9   :  { %s48_s28 = sshll.u32 %s883_s27, 4  ;;  %s884_s18 = smov [#allocation8]   ;;  %s49_s28 = int_to_ptr.vmem [resolvable:$true] %s48_s28 }
   0xa   :  { %51 = dma.hbm_to_vmem [thread:$0]  %s47_s26, 16, %s49_s28, [#allocation6]  }
   0xb   :  { %s74_s19 = sshll.u32 %s884_s18, 4  ;;  %s97_s21 = sshll.u32 %s1077_s9, 4  ;;  %s75_s19 = int_to_ptr.vmem [resolvable:$true] %s74_s19  ;;  %s98_s21 = int_to_ptr.hbm [resolvable:$true] %s97_s21 }
   0xc   :  { %77 = dma.hbm_to_vmem [thread:$0]  %s73_s30, 16, %s75_s19, [#allocation9]  }
   0xd   :  { %s885_s2 = smov [#allocation11]   ;;  %s1088_s25 = sld [smem:[#allocation24_spill]] }
   0xe   :  { %s99_s22 = sshll.u32 %s885_s2, 4  ;;  %s886_s29 = smov 64   ;;  %s100_s22 = int_to_ptr.vmem [resolvable:$true] %s99_s22 }
   0xf   :  { %s887_s6 = smov 4   ;;  %s888_s26 = smov [#allocation2]  }
  0x10   :  { %105 = dma.hbm_to_vmem [thread:$0]  %s98_s21, 256, %s100_s22, [#allocation12], %s886_s29, %s886_s29, %s887_s6  }
  0x11   :  { %s37_s28 = sshll.u32 %s888_s26, 4  ;;  %s59_s9 = sshll.u32 %s1072_s4, 4  ;;  %s38_s28 = int_to_ptr.vmem [resolvable:$true] %s37_s28  ;;  %s60_s9 = int_to_ptr.hbm [resolvable:$true] %s59_s9 }
  0x12   :  { %s82_s1 = sshll.u32 %s1075_s7, 4  ;;  %s889_s20 = smov [#allocation7]   ;;  %s83_s1 = int_to_ptr.hbm [resolvable:$true] %s82_s1 }
  0x13   :  { %s35_s27 = sshll.u32 %s1088_s25, 4  ;;  %s61_s2 = sshll.u32 %s889_s20, 4  ;;  %s36_s27 = int_to_ptr.hbm [resolvable:$true] %s35_s27  ;;  %s62_s2 = int_to_ptr.vmem [resolvable:$true] %s61_s2 }
  0x14   :  { %40 = dma.hbm_to_vmem [thread:$0]  %s36_s27, 32, %s38_s28, [#allocation3]  }
  0x15   :  { %64 = dma.hbm_to_vmem [thread:$0]  %s60_s9, 16, %s62_s2, [#allocation6]  }
  0x16   :  { %s890_s21 = smov [#allocation10]   ;;  %s112_s25 = sshll.u32 %s1079_s11, 4  ;;  %s113_s25 = int_to_ptr.hbm [resolvable:$true] %s112_s25 }
  0x17   :  { %s84_s22 = sshll.u32 %s890_s21, 4  ;;  %s127_s7 = sshll.u32 %s1081_s13, 4  ;;  %s85_s22 = int_to_ptr.vmem [resolvable:$true] %s84_s22  ;;  %s128_s7 = int_to_ptr.hbm [resolvable:$true] %s127_s7 }
  0x18   :  { %90 = dma.hbm_to_vmem [thread:$0]  %s83_s1, 256, %s85_s22, [#allocation9], %s886_s29, %s886_s29, %s887_s6  }
  0x19   :  { %s891_s26 = smov [#allocation13]   ;;  %s892_s0 = smov [#allocation14]  }
  0x1a   :  { %s114_s28 = sshll.u32 %s891_s26, 4  ;;  %s129_s11 = sshll.u32 %s892_s0, 4  ;;  %s115_s28 = int_to_ptr.vmem [resolvable:$true] %s114_s28  ;;  %s130_s11 = int_to_ptr.vmem [resolvable:$true] %s129_s11 }
  0x1b   :  { %120 = dma.hbm_to_vmem [thread:$0]  %s113_s25, 256, %s115_s28, [#allocation12], %s886_s29, %s886_s29, %s887_s6  }
  0x1c   :  { %135 = dma.hbm_to_vmem [thread:$0]  %s128_s7, 256, %s130_s11, [#allocation15], %s886_s29, %s886_s29, %s887_s6  }
  0x1d   :  { %871 = dma.done.wait [#allocation3], 32  }
  0x1e   :  { %872 = vsyncadd [#allocation3], 4294967264 }
  0x1f   :  { %873 = dma.done.wait [#allocation6], 32  }
  0x20   :  { %874 = vsyncadd [#allocation6], 4294967264 }
  0x21   :  { %875 = dma.done.wait [#allocation9], 272  }
  0x22   :  { %876 = vsyncadd [#allocation9], 4294967024 }
  0x23   :  { %877 = dma.done.wait [#allocation12], 512  }
  0x24   :  { %878 = vsyncadd [#allocation12], 4294966784 }
  0x25   :  { %879 = dma.done.wait [#allocation15], 256  }
  0x26   :  { %880 = vsyncadd [#allocation15], 4294967040  ;;  %vm191_vm0 = vcmask 1041408   ;;  %v177_v0 = vld [vmem:[#allocation2] sm:$0x3]  ;;  %s1089_s9 = sld [smem:[#allocation23_spill]] }
  0x27   :  { %v193_v1 = vsel %vm191_vm0, %v177_v0, 0  ;;  %vm187_vm1 = vcmask 31744   ;;  %v620_v3 = vld [vmem:[%s1071_s3 + $0x8] sm:$0xff]  ;;  %v619_v4 = vld [vmem:[%s1071_s3] sm:$0xff]  ;;  %vm232_vm2 = vcmask 261120   ;;  %v624_v23 = vld [vmem:[#allocation10 + $0x8] sm:$0xff] }
  0x28   :  { %202 = vmatpush.bf16.msra.mxu0 %v193_v1  ;;  %242 = vmatpush.bf16.msra.mxu1 %v620_v3  ;;  %v644_v6 = vld [vmem:[#allocation5] ss:$0 sm:$0xff]  ;;  %v622_v13 = vld [vmem:[%s1073_s5 + $0x8] sm:$0xff]  ;;  %v645_v16 = vld [vmem:[#allocation7] ss:$0 sm:$0xff]  ;;  %vm325_vm3 = vcmask 1041409  }
  0x29   :  { %282 = vmatpush.bf16.msra.mxu2 %v622_v13  ;;  %v621_v14 = vld [vmem:[%s1073_s5] sm:$0xff]  ;;  %349 = vmatpush.bf16.msra.mxu3 %v624_v23  ;;  %v623_v25 = vld [vmem:[#allocation10] sm:$0xff]  ;;  %v625_v32 = vld [vmem:[#allocation11] sm:$0xff]  ;;  %vm526_vm7 = vcmask 123904  }
  0x2a   :  { %v646_v24 = vld [vmem:[#allocation8] ss:$0 sm:$0xff]  ;;  %v628_v58 = vld [vmem:[#allocation13 + $0x8] sm:$0xff]  ;;  %v627_v59 = vld [vmem:[#allocation13] sm:$0xff] }
  0x2b   :  { %v626_v30 = vld [vmem:[#allocation11 + $0x8] sm:$0xff] }
  0x2c   :  { %v618_v2 = vld [vmem:[%s1089_s9] sm:$0xff]  ;;  %243 = vmatpush.bf16.msra.mxu1 %v619_v4  ;;  %386 = vmatpush.bf16.msrb.mxu0 %v626_v30  ;;  %v629_v4 = vld [vmem:[#allocation14] sm:$0xff] }
  0x2d   :  { %553 = vmatmul.msk.bf16.vlgmr.msra.gmra.mxu0 %vm187_vm1, %v618_v2  ;;  %283 = vmatpush.bf16.msra.mxu2 %v621_v14  ;;  %v316_v60 = vld [vmem:[%s1076_s8] sm:$0x1] }
  0x2e   :  { %350 = vmatpush.bf16.msra.mxu3 %v623_v25  ;;  %v317_v61 = vmul.f32 8.0, %v316_v60  ;;  %v630_v3 = vld [vmem:[#allocation14 + $0x8] sm:$0xff] }
  0x2f   :  { %v648_v13 = vld [vmem:[%s1080_s12] ss:$0 sm:$0xff] }
  0x30   :  { %387 = vmatpush.bf16.msrb.mxu0 %v625_v32  ;;  %424 = vmatpush.bf16.msrb.mxu1 %v628_v58  ;;  %v319_v62 = vperm.slane %v317_v61, 0  ;;  %v650_v25 = vld [vmem:[%s1084_s16] ss:$0 sm:$0xff]  ;;  %s535_s16 = sshll.u32 %s1085_s17, 4  ;;  %s536_s16 = int_to_ptr.hbm [resolvable:$true] %s535_s16 }
  0x31   :  { %462 = vmatpush.bf16.msrb.mxu2 %v630_v3 }
  0x34   :  { %425 = vmatpush.bf16.msrb.mxu1 %v627_v59 }
  0x35   :  { %463 = vmatpush.bf16.msrb.mxu2 %v629_v4 }
  0xaa   :  { %v204_v5 = vpop.f32.mrf.mxu0 }
  0xab   :  { %v205_v7 = vadd.f32 %v644_v6, %v204_v5  ;;  %v647_v5 = vld [vmem:[%s1078_s10] ss:$0 sm:$0xff] }
  0xad   :  { %v209_v10 = vmax.f32 %v205_v7, 0.0 }
  0xb2   :  { %v206_v8 = vpop.f32.mrf.mxu0 }
  0xb3   :  { %v207_v9 = vadd.f32 %v644_v6, %v206_v8 }
  0xb5   :  { %v210_v11 = vmax.f32 %v207_v9, 0.0 }
  0xb7   :  { %v211_v12 = vpack.c.bf16 %v210_v11, %v209_v10  ;;  %v632_v11 = vld [vmem:[%s1083_s15 + $0x8] sm:$0xff] }
  0xb8   :  { %500 = vmatpush.bf16.msrb.mxu3 %v632_v11 }
  0xb9   :  { %562 = vmatmul.msk.bf16.vlgmr.msra.gmra.mxu1 %vm232_vm2, %v211_v12  ;;  %v631_v12 = vld [vmem:[%s1083_s15] sm:$0xff] }
  0xbc   :  { %501 = vmatpush.bf16.msrb.mxu3 %v631_v12 }
 0x136   :  { %v245_v15 = vpop.f32.mrf.mxu1 }
 0x137   :  { %v246_v17 = vadd.f32 %v645_v16, %v245_v15 }
 0x139   :  { %v250_v20 = vmax.f32 %v246_v17, 0.0 }
 0x13e   :  { %v247_v18 = vpop.f32.mrf.mxu1 }
 0x13f   :  { %v248_v19 = vadd.f32 %v645_v16, %v247_v18 }
 0x141   :  { %v251_v21 = vmax.f32 %v248_v19, 0.0  ;;  %v649_v19 = vld [vmem:[%s1082_s14] ss:$0 sm:$0xff]  ;;  %s893_s14 = smov [#allocation16]  }
 0x142   :  { %s533_s28 = sshll.u32 %s893_s14, 4  ;;  %s534_s28 = int_to_ptr.vmem [resolvable:$true] %s533_s28 }
 0x143   :  { %v252_v22 = vpack.c.bf16 %v251_v21, %v250_v20 }
 0x145   :  { %571 = vmatmul.msk.bf16.vlgmr.msra.gmra.mxu2 %vm232_vm2, %v252_v22 }
 0x1c8   :  { %v285_v26 = vpop.f32.mrf.mxu2 }
 0x1c9   :  { %v286_v27 = vadd.f32 %v646_v24, %v285_v26 }
 0x1cb   :  { %v290_v28 = vmax.f32 %v286_v27, 0.0 }
 0x1cd   :  { %v292_v29 = vpack.c.bf16 %v290_v28, %v290_v28 }
 0x1cf   :  { %v294_v31 = vunpack.c.l.bf16 %v292_v29 }
 0x1d0   :  { %v287_v33 = vpop.f32.mrf.mxu2 }
 0x1d1   :  { %v296_v34 = vsel %vm232_vm2, %v294_v31, 0.0  ;;  %v288_v35 = vadd.f32 %v646_v24, %v287_v33 }
 0x1d2   :  { %v297_v36 = vrot.slane %v296_v34, 4 }
 0x1d3   :  { %v291_v37 = vmax.f32 %v288_v35, 0.0 }
 0x1d4   :  { %v298_v38 = vadd.f32 %v297_v36, %v296_v34 }
 0x1d5   :  { %v293_v39 = vpack.c.bf16 %v291_v37, %v291_v37 }
 0x1d6   :  { %v299_v40 = vrot.slane %v298_v38, 2 }
 0x1d7   :  { %v295_v41 = vunpack.c.l.bf16 %v293_v39 }
 0x1d8   :  { %v300_v42 = vadd.f32 %v299_v40, %v298_v38 }
 0x1d9   :  { %v303_v43 = vsel %vm232_vm2, %v295_v41, 0.0 }
 0x1da   :  { %v304_v44 = vrot.slane %v303_v43, 4  ;;  %v301_v45 = vrot.slane %v300_v42, 1 }
 0x1dc   :  { %v305_v46 = vadd.f32 %v304_v44, %v303_v43  ;;  %v302_v48 = vadd.f32 %v301_v45, %v300_v42 }
 0x1de   :  { %v306_v47 = vrot.slane %v305_v46, 2  ;;  %v310_v52 = vpack.c.bf16 %v302_v48, %v302_v48 }
 0x1e0   :  { %v307_v49 = vadd.f32 %v306_v47, %v305_v46  ;;  %v323_v54 = vunpack.c.l.b16 %v310_v52 }
 0x1e2   :  { %v308_v50 = vrot.slane %v307_v49, 1 }
 0x1e4   :  { %v309_v51 = vadd.f32 %v308_v50, %v307_v49 }
 0x1e6   :  { %v311_v53 = vpack.c.bf16 %v309_v51, %v309_v51 }
 0x1e8   :  { %v324_v55 = vunpack.c.l.b16 %v311_v53 }
 0x1ea   :  { %v326_v56 = vsel %vm325_vm3, %v324_v55, %v323_v54 }
 0x1eb   :  { %v327_v57 = vpack.c.b16 %v326_v56, %v326_v56 }
 0x1ed   :  { %580 = vmatmul.msk.bf16.vlgmr.msra.gmra.mxu3 %vm232_vm2, %v327_v57 }
 0x270   :  { %v352_v63 = vpop.f32.mrf.mxu3 }
 0x271   :  { %v353_v0 = vadd.f32 %v352_v63, %v319_v62 }
 0x273   :  { %v356_v1 = vpack.c.bf16 %v353_v0, %v353_v0 }
 0x275   :  { %589 = vmatmul.msk.bf16.vlgmr.msrb.gmra.mxu0 %vm232_vm2, %v356_v1 }
 0x278   :  { %v354_v2 = vpop.f32.mrf.mxu3 }
 0x2f2   :  { %v389_v6 = vpop.f32.mrf.mxu0 }
 0x2f3   :  { %v390_v7 = vadd.f32 %v647_v5, %v389_v6 }
 0x2f5   :  { %v393_v8 = vmax.f32 %v390_v7, 0.0 }
 0x2f7   :  { %v394_v9 = vpack.c.bf16 %v393_v8, %v393_v8 }
 0x2f9   :  { %598 = vmatmul.msk.bf16.vlgmr.msrb.gmra.mxu1 %vm232_vm2, %v394_v9 }
 0x2fa   :  { %v391_v10 = vpop.f32.mrf.mxu0 }
 0x376   :  { %v427_v14 = vpop.f32.mrf.mxu1 }
 0x377   :  { %v428_v15 = vadd.f32 %v648_v13, %v427_v14 }
 0x379   :  { %v431_v16 = vmax.f32 %v428_v15, 0.0 }
 0x37b   :  { %v432_v17 = vpack.c.bf16 %v431_v16, %v431_v16 }
 0x37d   :  { %607 = vmatmul.msk.bf16.vlgmr.msrb.gmra.mxu2 %vm232_vm2, %v432_v17 }
 0x37e   :  { %v429_v18 = vpop.f32.mrf.mxu1 }
 0x400   :  { %v465_v20 = vpop.f32.mrf.mxu2 }
 0x401   :  { %v466_v21 = vadd.f32 %v649_v19, %v465_v20 }
 0x403   :  { %v469_v22 = vmax.f32 %v466_v21, 0.0 }
 0x405   :  { %v470_v23 = vpack.c.bf16 %v469_v22, %v469_v22 }
 0x407   :  { %616 = vmatmul.msk.bf16.vlgmr.msrb.gmra.mxu3 %vm232_vm2, %v470_v23 }
 0x408   :  { %v467_v24 = vpop.f32.mrf.mxu2 }
 0x48a   :  { %v503_v26 = vpop.f32.mrf.mxu3 }
 0x48b   :  { %v504_v27 = vadd.f32 %v650_v25, %v503_v26 }
 0x48d   :  { %v617_v28 = vmul.f32 -1.442695, %v504_v27 }
 0x48f   :  { %651 = vpow2.f32 %v617_v28 }
 0x492   :  { %v505_v29 = vpop.f32.mrf.mxu3 }
 0x495   :  { %v652_v30 = vpop.eup %651 }
 0x496   :  { %v510_v31 = vadd.f32 1.0, %v652_v30 }
 0x498   :  { %653 = vrcp.f32 %v510_v31  ;;  %v522_v35 = vand.u32 2147483648, %v510_v31  ;;  %v520_v37 = vand.u32 2147483647, %v510_v31  ;;  %vm516_vm5 = vweird.f32 %v510_v31 }
 0x49a   :  { %v523_v39 = vor.u32 1.1754944e-38, %v522_v35  ;;  %vm521_vm8 = vcmp.eq.f32.partialorder %v520_v37, 8.507059e+37 }
 0x49e   :  { %v654_v32 = vpop.eup %653 }
 0x49f   :  { %v512_v33 = vmul.f32 %v654_v32, %v510_v31  ;;  %vm517_vm4 = vweird.f32 %v654_v32 }
 0x4a0   :  { %vm518_vm6 = vmor %vm516_vm5, %vm517_vm4 }
 0x4a1   :  { %v513_v34 = vsub.f32 1.0, %v512_v33 }
 0x4a3   :  { %v514_v36 = vmul.f32 %v654_v32, %v513_v34 }
 0x4a5   :  { %v515_v38 = vadd.f32 %v654_v32, %v514_v36 }
 0x4a7   :  { %v519_v40 = vsel %vm518_vm6, %v654_v32, %v515_v38 }
 0x4a8   :  { %v524_v41 = vsel %vm521_vm8, %v523_v39, %v519_v40 }
 0x4a9   :  { %527 = vst.msk [vmem:[#allocation16] sm:$0x3] %vm526_vm7, %v524_v41 }
 0x4aa   :  { %538 = dma.vmem_to_hbm [thread:$0]  %s534_s28, 32, %s536_s16, [#allocation4]  }
 0x4ab   :  { %881 = dma.done.wait [#allocation4], 32  }
 0x4ac   :  { %882 = vsyncadd [#allocation4], 4294967264 }
 0x4ad   :  { %543 = vsyncpa [#allocation3], 1 }
 0x4ae   :  { %544 = vsyncpa [#allocation6], 1 }
 0x4af   :  { %545 = vsyncpa [#allocation9], 1 }
 0x4b0   :  { %546 = vsyncpa [#allocation12], 1 }
 0x4b1   :  { %547 = vsyncpa [#allocation15], 1 }
 0x4b2   :  { %548 = vsyncpa [#allocation4], 1 }

</bundles_post_ra>
